<compile_context>
chip_gen: v7x
topology: tpu7x:2x2x1
jax: 0.10.0
libtpu: 0.0.40
codegen_flags: <defaults>
</compile_context>

<pallas_src>
import functools

import jax
import jax.numpy as jnp
from jax.experimental import pallas as pl
from jax.experimental.pallas import tpu as pltpu

EPSILON = 1e-6
LANES = 128


def _sublane_pack(dtype) -> int:
    return {1: 32, 2: 16, 4: 8}.get(jnp.dtype(dtype).itemsize, 8)


def _vmem_capacity_bytes() -> int:
    try:
        return int(pltpu.get_tpu_info().vmem_capacity_bytes)
    except Exception:
        return 32 << 20  # conservative default if the query is unavailable


def _normalize(x, normalization, channel_axis):
    if normalization == "sigmoid":
        return jax.nn.sigmoid(x)
    if normalization == "softmax":
        return jax.nn.softmax(x, axis=channel_axis)
    return x


def _dice_from_sums(inter, denom, weight):
    if weight is not None:
        inter = inter * weight
    dice = 2.0 * inter / jnp.maximum(denom, EPSILON)
    return 1.0 - jnp.mean(dice)


def _dice_loss_jax(x, target, normalization="sigmoid", weight=None):
    """Plain-JAX reference (also the fallback for volumes too small to tile)."""
    C = x.shape[1]
    p = _normalize(x.astype(jnp.float32), normalization, 1)
    t = target.astype(jnp.float32)
    p = jnp.moveaxis(p, 1, 0).reshape(C, -1)
    t = jnp.moveaxis(t, 1, 0).reshape(C, -1)
    inter = jnp.sum(p * t, axis=-1)
    denom = jnp.sum(p * p, axis=-1) + jnp.sum(t * t, axis=-1)
    return _dice_from_sums(inter, denom, weight)


def _dice_partial_kernel(x_ref, t_ref, inter_ref, denom_ref, *, normalization):
    """Grid = (B, splits, tiles). Lane-wide (C, 128) partial sums accumulated directly into the
    resident output blocks (same output block index across the `tiles` reduction axis)."""
    tile = pl.program_id(2)

    @pl.when(tile == 0)
    def _():
        inter_ref[...] = jnp.zeros_like(inter_ref)
        denom_ref[...] = jnp.zeros_like(denom_ref)

    x = x_ref[...].astype(jnp.float32)  # (C, TR, 128)
    t = t_ref[...].astype(jnp.float32)  # (C, TR, 128)

    if normalization == "sigmoid":
        p = 0.5 * (jnp.tanh(0.5 * x) + 1.0)   # single EUP transcendental
    elif normalization == "softmax":
        p = jax.nn.softmax(x, axis=0)          # channel axis (dim=1 in NCHW); full C in-block
    else:  # 'none'
        p = x

    inter_ref[...] += jnp.sum(p * t, axis=1)           # (C, 128) lane-wide partials
    denom_ref[...] += jnp.sum(p * p + t * t, axis=1)   # (C, 128)


def _pick_tile_rows(C, rows, x_dtype, t_dtype, vmem_cap, requested):
    pack = max(_sublane_pack(x_dtype), _sublane_pack(t_dtype))
    if requested is not None:
        tr = max(1, min(int(requested), rows))
        if tr != rows and rows >= pack:
            tr = max(pack, (tr // pack) * pack)
        return tr
    if rows < pack:
        return rows  # single full-dim tile (allowed: equals the array dim)
    bytes_per_row = C * LANES * (jnp.dtype(x_dtype).itemsize + jnp.dtype(t_dtype).itemsize)
    pair_target = 6 << 20                                     # ~3 MiB per input block
    pair_cap = max(1 << 20, (int(vmem_cap) * 3 // 5) // 2)    # 2 pipeline buffers < ~60% of VMEM
    pair_bytes = min(pair_target, pair_cap)
    tr = max(pack, (pair_bytes // bytes_per_row) // pack * pack)
    tr = min(tr, 4096)
    return min(tr, (rows // pack) * pack)


def abstract_dice_loss(x, target, normalization="sigmoid", weight=None, tile_rows=None):
    """1 - mean(per-channel Dice) of sigmoid / softmax(dim=1) / raw logits (any #spatial dims)."""
    assert normalization in ("sigmoid", "softmax", "none")
    assert x.shape == target.shape
    B, C = int(x.shape[0]), int(x.shape[1])
    hw = 1
    for d in x.shape[2:]:
        hw *= int(d)

    rows = hw // LANES
    if rows == 0:
        # TODO(synk): volume smaller than one 128-lane row -- nothing worth tiling on TPU.
        return _dice_loss_jax(x, target, normalization, weight)

    vmem_cap = _vmem_capacity_bytes()
    tr = _pick_tile_rows(C, rows, x.dtype, target.dtype, vmem_cap, tile_rows)

    n_tiles = rows // tr                                # full tiles available
    splits = 2 if (B == 1 and n_tiles >= 2) else 1      # engage both TCs on v7x when B == 1
    tiles_per_split = n_tiles // splits
    rows_k = splits * tiles_per_split * tr              # rows streamed by the kernel
    bulk = rows_k * LANES                               # voxels per (b, c) handled by the kernel

    x3 = x.reshape(B, C, hw)
    t3 = target.reshape(B, C, hw)
    if hw % LANES == 0:
        # Completely free reshape; the kernel simply never visits rows >= rows_k.
        x4 = x3.reshape(B, C, rows, LANES)
        t4 = t3.reshape(B, C, rows, LANES)
    else:
        # TODO(synk): XLA may materialize this slice+reshape as one copy of the bulk; spatial
        # volumes that are multiples of 128 take the copy-free path above.
        x4 = x3[:, :, :bulk].reshape(B, C, rows_k, LANES)
        t4 = t3[:, :, :bulk].reshape(B, C, rows_k, LANES)

    # Explicit VMEM budget: 2 inputs x 2 pipeline buffers x block, plus headroom for tiny outputs.
    pair_block_bytes = tr * C * LANES * (x.dtype.itemsize + target.dtype.itemsize)
    vmem_limit = int(min(vmem_cap * 0.9, 2 * pair_block_bytes + (8 << 20)))

    kernel = functools.partial(_dice_partial_kernel, normalization=normalization)
    grid = (B, splits, tiles_per_split)

    inter_p, denom_p = pl.pallas_call(
        kernel,
        out_shape=(jax.ShapeDtypeStruct((B, splits, C, LANES), jnp.float32),
                   jax.ShapeDtypeStruct((B, splits, C, LANES), jnp.float32)),
        grid_spec=pltpu.PrefetchScalarGridSpec(
            num_scalar_prefetch=0,
            grid=grid,
            in_specs=[
                pl.BlockSpec((None, C, tr, LANES),
                             lambda b, s, k: (b, 0, s * tiles_per_split + k, 0)),
                pl.BlockSpec((None, C, tr, LANES),
                             lambda b, s, k: (b, 0, s * tiles_per_split + k, 0)),
            ],
            out_specs=[
                pl.BlockSpec((None, None, C, LANES), lambda b, s, k: (b, s, 0, 0)),
                pl.BlockSpec((None, None, C, LANES), lambda b, s, k: (b, s, 0, 0)),
            ],
        ),
        compiler_params=pltpu.CompilerParams(
            dimension_semantics=("parallel", "parallel", "arbitrary"),
            vmem_limit_bytes=vmem_limit),
    )(x4, t4)

    # Tiny epilogue in plain JAX: reduce the per-(b, split) lane-wide partials.
    inter = jnp.sum(inter_p, axis=(0, 1, 3))   # (C,)
    denom = jnp.sum(denom_p, axis=(0, 1, 3))   # (C,)

    if bulk < hw:
        # Ragged tail (< 2*tile_rows*128 + 128 voxels per (b, c)) folded in directly, no padding.
        xt = x3[:, :, bulk:].astype(jnp.float32)
        tt = t3[:, :, bulk:].astype(jnp.float32)
        pt = _normalize(xt, normalization, 1)
        inter = inter + jnp.sum(pt * tt, axis=(0, 2))
        denom = denom + jnp.sum(pt * pt + tt * tt, axis=(0, 2))

    return _dice_from_sums(inter, denom, weight)


if __name__ == "__main__":
    key = jax.random.PRNGKey(0)
    k1, k2, k3, k4, k5, k6 = jax.random.split(key, 6)

    # 1) 128-aligned spatial size (fully copy-free path), all three normalizations.
    B, C, H, W = 2, 4, 16, 16
    x = jax.random.normal(k1, (B, C, H, W), dtype=jnp.float32)                   # logits
    target = (jax.random.uniform(k2, (B, C, H, W)) > 0.5).astype(jnp.float32)    # binary mask
    for norm in ("sigmoid", "softmax", "none"):
        loss = jax.block_until_ready(abstract_dice_loss(x, target, normalization=norm))
        ref = _dice_loss_jax(x, target, normalization=norm)
        assert jnp.allclose(loss, ref, atol=1e-5, rtol=1e-5), (norm, loss, ref)

    # 2) non-128-aligned spatial size (kernel on the aligned bulk + plain-JAX ragged tail).
    B2, C2, H2, W2 = 2, 3, 23, 23
    x2 = jax.random.normal(k3, (B2, C2, H2, W2), dtype=jnp.float32)
    t2 = (jax.random.uniform(k4, (B2, C2, H2, W2)) > 0.5).astype(jnp.float32)
    loss2 = jax.block_until_ready(abstract_dice_loss(x2, t2, normalization="softmax"))
    ref2 = _dice_loss_jax(x2, t2, normalization="softmax")
    assert jnp.allclose(loss2, ref2, atol=1e-5, rtol=1e-5), (loss2, ref2)

    # 3) B == 1 with explicit tile_rows: exercises the per-split parallel axis + channel weights.
    B3, C3, H3, W3 = 1, 2, 64, 64
    x3 = jax.random.normal(k5, (B3, C3, H3, W3), dtype=jnp.float32)
    t3 = (jax.random.uniform(k6, (B3, C3, H3, W3)) > 0.5).astype(jnp.float32)
    w3 = jnp.array([0.3, 0.7], dtype=jnp.float32)
    loss3 = jax.block_until_ready(
        abstract_dice_loss(x3, t3, normalization="sigmoid", weight=w3, tile_rows=8))
    ref3 = _dice_loss_jax(x3, t3, normalization="sigmoid", weight=w3)
    assert jnp.allclose(loss3, ref3, atol=1e-5, rtol=1e-5), (loss3, ref3)

    print("KERNEL_OK")
</pallas_src>

<mosaic_0001>
module attributes {stable_mosaic.version = 11 : i64} {
  func.func @_dice_partial_kernel(%arg0: i32, %arg1: i32, %arg2: i32, %arg3: memref<1x4x2x128xf32, #tpu.memory_space<vmem>>, %arg4: memref<1x4x2x128xf32, #tpu.memory_space<vmem>>, %arg5: memref<1x1x4x128xf32, #tpu.memory_space<vmem>>, %arg6: memref<1x1x4x128xf32, #tpu.memory_space<vmem>>) attributes {dimension_semantics = [#tpu.dimension_semantics<parallel>, #tpu.dimension_semantics<parallel>, #tpu.dimension_semantics<arbitrary>], iteration_bounds = array<i64: 2, 1, 1>, scalar_prefetch = 0 : i64, scratch_operands = 0 : i64, tpu.core_type = #tpu.core_type<tc>, window_params = [{transform_indices = @transform_0, window_bounds = array<i64: 1, 4, 2, 128>}, {transform_indices = @transform_1, window_bounds = array<i64: 1, 4, 2, 128>}, {transform_indices = @transform_2, window_bounds = array<i64: 1, 1, 4, 128>}, {transform_indices = @transform_3, window_bounds = array<i64: 1, 1, 4, 128>}]} {
    %c0_i32 = arith.constant 0 : i32
    %0 = arith.cmpi eq, %arg2, %c0_i32 : i32
    %1 = arith.extui %0 : i1 to i32
    %c0_i32_0 = arith.constant 0 : i32
    %2 = arith.cmpi ne, %1, %c0_i32_0 : i32
    scf.if %2 {
      %cst_28 = arith.constant 0.000000e+00 : f32
      %32 = vector.broadcast %cst_28 : f32 to vector<4x128xf32>
      %c0_29 = arith.constant 0 : index
      %c0_30 = arith.constant 0 : index
      %c0_31 = arith.constant 0 : index
      %c0_32 = arith.constant 0 : index
      %33 = vector.load %arg5[%c0_29, %c0_30, %c0_31, %c0_32] : memref<1x1x4x128xf32, #tpu.memory_space<vmem>>, vector<1x1x4x128xf32>
      %34 = vector.shape_cast %33 : vector<1x1x4x128xf32> to vector<4x128xf32>
      %35 = vector.shape_cast %32 : vector<4x128xf32> to vector<1x1x4x128xf32>
      tpu.vector_store %arg5[%c0_29, %c0_30, %c0_31, %c0_32], %35 {strides = array<i32>} : memref<1x1x4x128xf32, #tpu.memory_space<vmem>>, vector<1x1x4x128xf32>,
      %cst_33 = arith.constant 0.000000e+00 : f32
      %36 = vector.broadcast %cst_33 : f32 to vector<4x128xf32>
      %c0_34 = arith.constant 0 : index
      %c0_35 = arith.constant 0 : index
      %c0_36 = arith.constant 0 : index
      %c0_37 = arith.constant 0 : index
      %37 = vector.load %arg6[%c0_34, %c0_35, %c0_36, %c0_37] : memref<1x1x4x128xf32, #tpu.memory_space<vmem>>, vector<1x1x4x128xf32>
      %38 = vector.shape_cast %37 : vector<1x1x4x128xf32> to vector<4x128xf32>
      %39 = vector.shape_cast %36 : vector<4x128xf32> to vector<1x1x4x128xf32>
      tpu.vector_store %arg6[%c0_34, %c0_35, %c0_36, %c0_37], %39 {strides = array<i32>} : memref<1x1x4x128xf32, #tpu.memory_space<vmem>>, vector<1x1x4x128xf32>,
    } else {
    }
    %c0 = arith.constant 0 : index
    %c0_1 = arith.constant 0 : index
    %c0_2 = arith.constant 0 : index
    %c0_3 = arith.constant 0 : index
    %3 = vector.load %arg3[%c0, %c0_1, %c0_2, %c0_3] : memref<1x4x2x128xf32, #tpu.memory_space<vmem>>, vector<1x4x2x128xf32>
    %4 = vector.shape_cast %3 : vector<1x4x2x128xf32> to vector<4x2x128xf32>
    %c0_4 = arith.constant 0 : index
    %c0_5 = arith.constant 0 : index
    %c0_6 = arith.constant 0 : index
    %c0_7 = arith.constant 0 : index
    %5 = vector.load %arg4[%c0_4, %c0_5, %c0_6, %c0_7] : memref<1x4x2x128xf32, #tpu.memory_space<vmem>>, vector<1x4x2x128xf32>
    %6 = vector.shape_cast %5 : vector<1x4x2x128xf32> to vector<4x2x128xf32>
    %cst = arith.constant 5.000000e-01 : f32
    %7 = vector.broadcast %cst : f32 to vector<4x2x128xf32>
    %8 = arith.mulf %7, %4 : vector<4x2x128xf32>
    %9 = math.tanh %8 : vector<4x2x128xf32>
    %cst_8 = arith.constant 1.000000e+00 : f32
    %10 = vector.broadcast %cst_8 : f32 to vector<4x2x128xf32>
    %11 = arith.addf %9, %10 : vector<4x2x128xf32>
    %cst_9 = arith.constant 5.000000e-01 : f32
    %12 = vector.broadcast %cst_9 : f32 to vector<4x2x128xf32>
    %13 = arith.mulf %12, %11 : vector<4x2x128xf32>
    %c0_10 = arith.constant 0 : index
    %c0_11 = arith.constant 0 : index
    %c0_12 = arith.constant 0 : index
    %c0_13 = arith.constant 0 : index
    %14 = vector.load %arg5[%c0_10, %c0_11, %c0_12, %c0_13] : memref<1x1x4x128xf32, #tpu.memory_space<vmem>>, vector<1x1x4x128xf32>
    %15 = vector.shape_cast %14 : vector<1x1x4x128xf32> to vector<4x128xf32>
    %16 = arith.mulf %13, %6 : vector<4x2x128xf32>
    %cst_14 = arith.constant dense<0.000000e+00> : vector<4x128xf32>
    %17 = vector.multi_reduction <add>, %16, %cst_14 [1] : vector<4x2x128xf32> to vector<4x128xf32>
    %18 = arith.addf %15, %17 : vector<4x128xf32>
    %c0_15 = arith.constant 0 : index
    %c0_16 = arith.constant 0 : index
    %c0_17 = arith.constant 0 : index
    %c0_18 = arith.constant 0 : index
    %19 = vector.load %arg5[%c0_15, %c0_16, %c0_17, %c0_18] : memref<1x1x4x128xf32, #tpu.memory_space<vmem>>, vector<1x1x4x128xf32>
    %20 = vector.shape_cast %19 : vector<1x1x4x128xf32> to vector<4x128xf32>
    %21 = vector.shape_cast %18 : vector<4x128xf32> to vector<1x1x4x128xf32>
    tpu.vector_store %arg5[%c0_15, %c0_16, %c0_17, %c0_18], %21 {strides = array<i32>} : memref<1x1x4x128xf32, #tpu.memory_space<vmem>>, vector<1x1x4x128xf32>,
    %c0_19 = arith.constant 0 : index
    %c0_20 = arith.constant 0 : index
    %c0_21 = arith.constant 0 : index
    %c0_22 = arith.constant 0 : index
    %22 = vector.load %arg6[%c0_19, %c0_20, %c0_21, %c0_22] : memref<1x1x4x128xf32, #tpu.memory_space<vmem>>, vector<1x1x4x128xf32>
    %23 = vector.shape_cast %22 : vector<1x1x4x128xf32> to vector<4x128xf32>
    %24 = arith.mulf %13, %13 : vector<4x2x128xf32>
    %25 = arith.mulf %6, %6 : vector<4x2x128xf32>
    %26 = arith.addf %24, %25 : vector<4x2x128xf32>
    %cst_23 = arith.constant dense<0.000000e+00> : vector<4x128xf32>
    %27 = vector.multi_reduction <add>, %26, %cst_23 [1] : vector<4x2x128xf32> to vector<4x128xf32>
    %28 = arith.addf %23, %27 : vector<4x128xf32>
    %c0_24 = arith.constant 0 : index
    %c0_25 = arith.constant 0 : index
    %c0_26 = arith.constant 0 : index
    %c0_27 = arith.constant 0 : index
    %29 = vector.load %arg6[%c0_24, %c0_25, %c0_26, %c0_27] : memref<1x1x4x128xf32, #tpu.memory_space<vmem>>, vector<1x1x4x128xf32>
    %30 = vector.shape_cast %29 : vector<1x1x4x128xf32> to vector<4x128xf32>
    %31 = vector.shape_cast %28 : vector<4x128xf32> to vector<1x1x4x128xf32>
    tpu.vector_store %arg6[%c0_24, %c0_25, %c0_26, %c0_27], %31 {strides = array<i32>} : memref<1x1x4x128xf32, #tpu.memory_space<vmem>>, vector<1x1x4x128xf32>,
    return
  }
  func.func @transform_0(%arg0: i32, %arg1: i32, %arg2: i32) -> (i32, i32, i32, i32) {
    %c1_i32 = arith.constant 1 : i32
    %0 = arith.muli %arg1, %c1_i32 : i32
    %1 = arith.addi %0, %arg2 : i32
    %c0_i32 = arith.constant 0 : i32
    %c0_i32_0 = arith.constant 0 : i32
    %c0_i32_1 = arith.constant 0 : i32
    return %arg0, %c0_i32, %1, %c0_i32_0 : i32, i32, i32, i32
  }
  func.func @transform_1(%arg0: i32, %arg1: i32, %arg2: i32) -> (i32, i32, i32, i32) {
    %c1_i32 = arith.constant 1 : i32
    %0 = arith.muli %arg1, %c1_i32 : i32
    %1 = arith.addi %0, %arg2 : i32
    %c0_i32 = arith.constant 0 : i32
    %c0_i32_0 = arith.constant 0 : i32
    %c0_i32_1 = arith.constant 0 : i32
    return %arg0, %c0_i32, %1, %c0_i32_0 : i32, i32, i32, i32
  }
  func.func @transform_2(%arg0: i32, %arg1: i32, %arg2: i32) -> (i32, i32, i32, i32) {
    %c0_i32 = arith.constant 0 : i32
    %c0_i32_0 = arith.constant 0 : i32
    %c0_i32_1 = arith.constant 0 : i32
    return %arg0, %arg1, %c0_i32, %c0_i32_0 : i32, i32, i32, i32
  }
  func.func @transform_3(%arg0: i32, %arg1: i32, %arg2: i32) -> (i32, i32, i32, i32) {
    %c0_i32 = arith.constant 0 : i32
    %c0_i32_0 = arith.constant 0 : i32
    %c0_i32_1 = arith.constant 0 : i32
    return %arg0, %arg1, %c0_i32, %c0_i32_0 : i32, i32, i32, i32
  }
}

</mosaic_0001>

<bundles_post_ra>
// kernel: tpu_custom_call.1
= control target key start
LH: loop header
LB: loop body
LE: loop exit
PB: predicated region body
PF: predicated region fallthrough
CT: control target
= control target key end

     0   :  { %9 = vsyncpa [#allocation3], 0  ;;  %s1192_s0 = inlined_call_operand.hbm [shape: f32[2,4,2,128], index: 0, kind: input, shape index: {}]   ;;  %s1193_s1 = inlined_call_operand.hbm [shape: f32[2,4,2,128], index: 1, kind: input, shape index: {}]   ;;  %s1194_s2 = inlined_call_operand.hbm [shape: f32[2,1,4,128], index: 2, kind: output, shape index: {0}]   ;;  %s1195_s3 = inlined_call_operand.hbm [shape: f32[2,1,4,128], index: 3, kind: output, shape index: {1}]  }
   0x1   :  { %11 = vsyncpa [#allocation3 + $0x1], 0 }
   0x2   :  { %12 = vsyncpa [#allocation6], 0 }
   0x3   :  { %14 = vsyncpa [#allocation6 + $0x1], 0 }
   0x4   :  { %15 = vsyncpa [#allocation4], 0 }
   0x5   :  { %17 = vsyncpa [#allocation4 + $0x1], 0 }
   0x6   :  { %18 = vsyncpa [#allocation9], 0 }
   0x7   :  { %20 = vsyncpa [#allocation9 + $0x1], 0  ;;  %s896_s12 = smov 0   ;;  %s898_s13 = smov 0  }
   0x8   :  { %s900_s14 = smov 0   ;;  %s902_s15 = smov 0  }
   0x9   :  { %s904_s16 = smov 0   ;;  %s906_s17 = smov 0  }
   0xa LB: > { %s583_s18 = sadd.s32 4294967295, %s867_s17   ;;  %s584_s19 = sadd.s32 4294967294, %s867_s17   ;;  %s867_s17 = sphi %s906_s17, %s26_s17   ;;  %s863_s16 = sphi %s904_s16, %s1213_s16   ;;  %s859_s15 = sphi %s902_s15, %s1212_s15   ;;  %s855_s14 = sphi %s900_s14, %s1211_s14   ;;  %s851_s13 = sphi %s898_s13, %s1210_s13   ;;  %s847_s12 = sphi %s896_s12, %s1209_s12  }
   0xb   : > { %s45_s20 = sadd.s32 1, %s863_s16  ;;  %s56_s21 = sadd.s32 1, %s855_s14 }
   0xc   : > { %p47_p0 = scmp.ge.s32.totalorder %s45_s20, 2  ;;  %p63_p1 = scmp.ne.s32.totalorder %s855_s14, %s851_s13 }
   0xd   : > { %p64_p2 = scmp.eq.s32.totalorder %s867_s17, 0  ;;  %p69_p3 = scmp.ne.s32.totalorder %s851_s13, %s847_s12 }
   0xe   : > { %s1215_s20 = smov (%p47_p0, %s45_s20), 0  ;;  %p70_p5 = scmp.eq.s32.totalorder %s583_s18, 0 }
   0xf   : > { %p937_p4 = por %p64_p2, %p63_p1  ;;  %s51_s23 = ssub.s32 %s863_s16, %s1215_s20 }
  0x10   : > { %p125_p6 = scmp.eq.s32.totalorder %s583_s18, 1  ;;  %p54_p7 = scmp.eq.s32.totalorder %s51_s23, 0 }
  0x11   : > { %p943_p8 = por %p70_p5, %p69_p3  ;;  %p131_p10 = scmp.eq.s32.totalorder %s584_s19, 1 }
  0x12   : > { %p947_p9 = por %p125_p6, %p63_p1  ;;  %p628_p13 = scmp.lt.s32.totalorder %s867_s17, 2 }
  0x13   : > { %s1199_s24 = scalar_select %p943_p8, 1, 0 }
  0x14   : > { %s1200_s25 = scalar_select %p947_p9, 1, 0 }
  0x15   : > { %s952_s26 = scalar_select %p54_p7, %s855_s14, %s56_s21  }
  0x16   : > { %p954_p11 = por %p131_p10, %p69_p3  ;;  %s961_s28 = sand.u32 1, %s855_s14  }
  0x17   : > { %s587_s29 = sshll.u32 %s961_s28, 3  ;;  %s604_s30 = sshll.u32 %s863_s16, 7 }
  0x18   : > { %s1201_s27 = scalar_select %p954_p11, 1, 0 }
  0x19   : > { %s970_s6 = scalar_lea.hbm %s1192_s0, %s604_s30  ;;  %s183_s7 = scalar_lea.vmem [#allocation2], %s587_s29 }
  0x1a   : > { %s192_s8 = sshll.u32 %s183_s7, 4  ;;  %p978_p0 = pnand %p628_p13, %p937_p4  ;;  %s974_s8 = int_to_ptr.vmem [resolvable:$true] %s192_s8 }
  0x1b   : > { %s180_s10 = scalar_lea.sflag [#allocation3], %s961_s28  ;;  %s689_s11 = scalar_lea.hbm %s970_s6, 128 }
  0x1c   : > { %p690_p2 = scmp.ne.s32.totalorder %s970_s6, %s689_s11  ;;  %p691_p3 = pneg %p978_p0 }
  0x1d   : > { %s694_s21 = scalar_lea.hbm %s1192_s0, 256  ;;  %p695_p4 = scmp.lt.u32.totalorder %s970_s6, %s1192_s0 }
  0x1e   : > { %p692_p5 = pnand %p691_p3, %p690_p2  ;;  %p696_p7 = scmp.lt.u32.totalorder %s694_s21, %s689_s11 }
  0x1f   : > { %p698_p13 = scmp.lt.u32.totalorder %s689_s11, %s970_s6 }
  0x20   : > { %p693_p6 = pneg %p692_p5  ;;  %p697_p10 = por %p696_p7, %p695_p4 }
  0x22   : > { %p699_p12 = por %p698_p13, %p697_p10 }
  0x24   : > { %p700_p1 = pnand %p699_p12, %p693_p6 }
  0x26   : > { %703 = shalt.err (!%p700_p1)
}
  0x27   : > { %s704_s4 = scalar_lea.vmem %s974_s8, 128  ;;  %s869_s5 = smov [#allocation2]  }
  0x28   : > { %p705_p2 = scmp.ne.s32.totalorder %s974_s8, %s704_s4  ;;  %s709_s7 = sshll.u32 %s869_s5, 4  ;;  %s710_s7 = int_to_ptr.vmem [resolvable:$false] %s709_s7 }
  0x29   : > { %s711_s18 = scalar_lea.vmem %s710_s7, 256  ;;  %p712_p9 = scmp.lt.s32.totalorder %s974_s8, %s710_s7 }
  0x2a   : > { %p707_p5 = pnand %p705_p2, %p691_p3  ;;  %p713_p4 = scmp.lt.s32.totalorder %s711_s18, %s704_s4 }
  0x2c   : > { %p708_p11 = pneg %p707_p5  ;;  %p714_p7 = por %p713_p4, %p712_p9 }
  0x2e   : > { %p715_p10 = pnand %p714_p7, %p708_p11 }
  0x30   : > { %718 = shalt.err (!%p715_p10)
}
  0x31   : > { %s870_s11 = smov 32   ;;  %s871_s19 = smov 2  }
  0x32   : > { %617 = dma.hbm_to_vmem [thread:$0]  (!%p978_p0), %s970_s6, 128, %s974_s8, %s180_s10, %s870_s11, %s870_s11, %s871_s19  }
  0x33   : > { %p223_p9 = scmp.lt.s32.totalorder %s867_s17, 3  ;;  %s1020_s23 = scalar_lea.hbm %s1193_s1, %s604_s30 }
  0x34   : > { %p1203_p11 = scmp.ge.s32.totalorder %s867_s17, 1  ;;  %s206_s5 = scalar_lea.vmem [#allocation5], %s587_s29 }
  0x35   : > { %s215_s7 = sshll.u32 %s206_s5, 4  ;;  %s203_s6 = scalar_lea.sflag [#allocation6], %s961_s28  ;;  %s1030_s7 = int_to_ptr.vmem [resolvable:$true] %s215_s7 }
  0x36   : > { %p1024_p12 = pnand %p1203_p11, %p223_p9  ;;  %s719_s8 = scalar_lea.hbm %s1020_s23, 128 }
  0x37   : > { %p720_p1 = scmp.ne.s32.totalorder %s1020_s23, %s719_s8  ;;  %s724_s18 = scalar_lea.hbm %s1193_s1, 256 }
  0x38   : > { %p725_p2 = scmp.lt.u32.totalorder %s1020_s23, %s1193_s1  ;;  %p726_p5 = scmp.lt.u32.totalorder %s724_s18, %s719_s8 }
  0x39   : > { %p722_p6 = pnand %p720_p1, %p691_p3  ;;  %p728_p7 = scmp.lt.u32.totalorder %s719_s8, %s1020_s23 }
  0x3a   : > { %p727_p4 = por %p726_p5, %p725_p2 }
  0x3b   : > { %p723_p13 = pneg %p722_p6 }
  0x3c   : > { %p729_p10 = por %p728_p7, %p727_p4 }
  0x3e   : > { %p730_p9 = pnand %p729_p10, %p723_p13 }
  0x40   : > { %733 = shalt.err (!%p730_p9)
}
  0x41   : > { %s734_s29 = scalar_lea.vmem %s1030_s7, 128  ;;  %s872_s5 = smov [#allocation5]  }
  0x42   : > { %p735_p11 = scmp.ne.s32.totalorder %s1030_s7, %s734_s29  ;;  %s739_s30 = sshll.u32 %s872_s5, 4  ;;  %s740_s30 = int_to_ptr.vmem [resolvable:$false] %s739_s30 }
  0x43   : > { %s741_s10 = scalar_lea.vmem %s740_s30, 256  ;;  %p742_p8 = scmp.lt.s32.totalorder %s1030_s7, %s740_s30 }
  0x44   : > { %p737_p1 = pnand %p735_p11, %p691_p3  ;;  %p743_p2 = scmp.lt.s32.totalorder %s741_s10, %s734_s29 }
  0x46   : > { %p738_p6 = pneg %p737_p1  ;;  %p744_p5 = por %p743_p2, %p742_p8 }
  0x48   : > { %p745_p4 = pnand %p744_p5, %p738_p6 }
  0x4a   : > { %748 = shalt.err (!%p745_p4)
}
  0x4b   : > { %620 = dma.hbm_to_vmem [thread:$0]  (!%p978_p0), %s1020_s23, 128, %s1030_s7, %s203_s6, %s870_s11, %s870_s11, %s871_s19  }
  0x4c   : > { %227 = sbr.rel (%p1024_p12) target bundleno = 164 (0xa4), region = 28  ;;  %s1064_s8 = sand.u32 (!%p1024_p12), 1, %s851_s13  }
  0x4d   : > { %s594_s18 = sshll.u32 (!%p1024_p12), %s1064_s8, 3  ;;  %s230_s21 = scalar_lea.sflag (!%p1024_p12), [#allocation3], %s1064_s8 }
  0x4e   : > { %s233_s9 = scalar_lea.vmem (!%p1024_p12), [#allocation2], %s594_s18  ;;  %p1205_p8 = scmp.ne.s32.totalorder (!%p1024_p12), %s1199_s24, 0 }
  0x53   : > { %830 = dma.done.wait (%p1205_p8), %s230_s21, 128  }
  0x54   : > { %832 = vsyncadd (%p1205_p8), %s230_s21, 4294967168  ;;  %s239_s28 = scalar_lea.sflag [#allocation6], %s1064_s8  ;;  %s242_s11 = scalar_lea.vmem [#allocation5], %s594_s18 }
  0x55   : > { %834 = dma.done.wait (%p1205_p8), %s239_s28, 128  }
  0x56   : > { %836 = vsyncadd (%p1205_p8), %s239_s28, 4294967168  ;;  %s596_s19 = sshll.u32 %s1064_s8, 2  ;;  %v873_v0 = vmov 0.0   ;;  %v283_v1 = vld [vmem:[%s233_s9] sm:$0x3]  ;;  %vm312_vm0 = vcmask 1041408  }
  0x57   : > { %s1078_s23 = scalar_lea.vmem [#allocation7], %s596_s19  ;;  %s1081_s4 = scalar_lea.vmem [#allocation8], %s596_s19  ;;  %v284_v2 = vld [vmem:[%s233_s9 + $0x2] sm:$0x3]  ;;  %v285_v3 = vld [vmem:[%s233_s9 + $0x4] sm:$0x3] }
  0x58   : > { %281 = vst [vmem:[%s1078_s23] sm:$0xf] %v873_v0  ;;  %282 = vst [vmem:[%s1081_s4] sm:$0xf] %v873_v0  ;;  %v286_v4 = vld [vmem:[%s233_s9 + $0x6] sm:$0x3]  ;;  %v291_v5 = vmul.f32 0.5, %v283_v1  ;;  %v292_v6 = vmul.f32 0.5, %v284_v2 }
  0x59   : > { %v293_v7 = vmul.f32 0.5, %v285_v3  ;;  %v294_v8 = vmul.f32 0.5, %v286_v4  ;;  %v287_v10 = vld [vmem:[%s242_s11] sm:$0x3]  ;;  %v288_v12 = vld [vmem:[%s242_s11 + $0x2] sm:$0x3] }
  0x5a   : > { %681 = vtanh.f32 %v291_v5  ;;  %v289_v15 = vld [vmem:[%s242_s11 + $0x4] sm:$0x3]  ;;  %v290_v18 = vld [vmem:[%s242_s11 + $0x6] sm:$0x3]  ;;  %v359_v21 = vmul.f32 %v287_v10, %v287_v10  ;;  %v360_v24 = vmul.f32 %v288_v12, %v288_v12  ;;  %vm345_vm1 = vcmask 1041409   ;;  %s600_s24 = sshll.u32 %s859_s15, 6 }
  0x5b   : > { %683 = vtanh.f32 %v292_v6  ;;  %v361_v28 = vmul.f32 %v289_v15, %v289_v15  ;;  %v362_v32 = vmul.f32 %v290_v18, %v290_v18  ;;  %vm347_vm2 = vcmask 1042434   ;;  %s425_s7 = sshll.u32 %s1078_s23, 4  ;;  %s1104_s29 = scalar_lea.hbm %s1194_s2, %s600_s24  ;;  %s1106_s7 = int_to_ptr.vmem [resolvable:$true] %s425_s7 }
  0x5c   : > { %685 = vtanh.f32 %v293_v7  ;;  %vm349_vm3 = vcmask 1043459   ;;  %s439_s5 = sshll.u32 %s1081_s4, 4  ;;  %s406_s30 = scalar_lea.sflag [#allocation4], %s1064_s8  ;;  %s1144_s5 = int_to_ptr.vmem [resolvable:$true] %s439_s5 }
  0x5d   : > { %687 = vtanh.f32 %v294_v8  ;;  %s749_s10 = scalar_lea.vmem %s1106_s7, 64  ;;  %p1206_p3 = scmp.ne.s32.totalorder %s1200_s25, 0 }
  0x5e   : > { %p750_p0 = scmp.ne.s32.totalorder %s1106_s7, %s749_s10  ;;  %s874_s18 = smov [#allocation7]  }
  0x5f   : > { %s753_s21 = sshll.u32 %s874_s18, 4  ;;  %s754_s21 = int_to_ptr.vmem [resolvable:$false] %s753_s21 }
  0x60   : > { %p751_p12 = pnand %p750_p0, %p1206_p3  ;;  %s755_s9 = scalar_lea.vmem %s754_s21, 128 }
  0x61   : > { %p756_p7 = scmp.lt.s32.totalorder %s1106_s7, %s754_s21  ;;  %p757_p10 = scmp.lt.s32.totalorder %s755_s9, %s749_s10 }
  0x62   : > { %p752_p13 = pneg %p751_p12 }
  0x63   : > { %p758_p9 = por %p757_p10, %p756_p7 }
  0x64   : > { %v682_v9 = vpop.eup %681 }
  0x65   : > { %v684_v11 = vpop.eup %683  ;;  %v299_v13 = vadd.f32 1.0, %v682_v9  ;;  %p759_p11 = pnand %p758_p9, %p752_p13 }
  0x66   : > { %v686_v14 = vpop.eup %685  ;;  %v300_v16 = vadd.f32 1.0, %v684_v11 }
  0x67   : > { %v688_v17 = vpop.eup %687  ;;  %v301_v19 = vadd.f32 1.0, %v686_v14  ;;  %v303_v20 = vmul.f32 0.5, %v299_v13 }
  0x68   : > { %v302_v22 = vadd.f32 1.0, %v688_v17  ;;  %v304_v23 = vmul.f32 0.5, %v300_v16 }
  0x69   : > { %v305_v25 = vmul.f32 0.5, %v301_v19  ;;  %v308_v26 = vmul.f32 %v303_v20, %v287_v10  ;;  %v355_v27 = vmul.f32 %v303_v20, %v303_v20 }
  0x6a   : > { %v306_v29 = vmul.f32 0.5, %v302_v22  ;;  %v309_v30 = vmul.f32 %v304_v23, %v288_v12  ;;  %v356_v31 = vmul.f32 %v304_v23, %v304_v23 }
  0x6b   : > { %v310_v33 = vmul.f32 %v305_v25, %v289_v15  ;;  %v313_v34 = vsel %vm312_vm0, %v308_v26, 0.0  ;;  %v357_v35 = vmul.f32 %v305_v25, %v305_v25  ;;  %v363_v36 = vadd.f32 %v359_v21, %v355_v27 }
  0x6c   : > { %v311_v37 = vmul.f32 %v306_v29, %v290_v18  ;;  %v314_v38 = vrot.slane %v313_v34, 4  ;;  %v320_v39 = vsel %vm312_vm0, %v309_v30, 0.0  ;;  %v358_v40 = vmul.f32 %v306_v29, %v306_v29 }
  0x6d   : > { %v321_v41 = vrot.slane %v320_v39, 4  ;;  %v327_v42 = vsel %vm312_vm0, %v310_v33, 0.0  ;;  %v364_v43 = vadd.f32 %v360_v24, %v356_v31  ;;  %v365_v44 = vadd.f32 %v361_v28, %v357_v35  ;;  %v307_v24 = vld [vmem:[%s1078_s23] sm:$0xf] }
  0x6e   : > { %v315_v45 = vadd.f32 %v314_v38, %v313_v34  ;;  %v328_v46 = vrot.slane %v327_v42, 4  ;;  %v334_v47 = vsel %vm312_vm0, %v311_v37, 0.0  ;;  %v366_v48 = vadd.f32 %v362_v32, %v358_v40 }
  0x6f   : > { %v322_v49 = vadd.f32 %v321_v41, %v320_v39  ;;  %v335_v50 = vrot.slane %v334_v47, 4  ;;  %v367_v51 = vsel %vm312_vm0, %v363_v36, 0.0  ;;  %v374_v52 = vsel %vm312_vm0, %v364_v43, 0.0  ;;  %v354_v39 = vld [vmem:[%s1081_s4] sm:$0xf] }
  0x70   : > { %v316_v53 = vrot.slane %v315_v45, 2  ;;  %v329_v54 = vadd.f32 %v328_v46, %v327_v42  ;;  %v368_v55 = vrot.slane %v367_v51, 4  ;;  %v375_v56 = vrot.slane %v374_v52, 4 }
  0x71   : > { %v323_v57 = vrot.slane %v322_v49, 2  ;;  %v336_v58 = vadd.f32 %v335_v50, %v334_v47  ;;  %v381_v59 = vsel %vm312_vm0, %v365_v44, 0.0  ;;  %v388_v60 = vsel %vm312_vm0, %v366_v48, 0.0 }
  0x72   : > { %v317_v61 = vadd.f32 %v316_v53, %v315_v45  ;;  %v330_v62 = vrot.slane %v329_v54, 2  ;;  %v369_v63 = vadd.f32 %v368_v55, %v367_v51  ;;  %v376_v0 = vadd.f32 %v375_v56, %v374_v52 }
  0x73   : > { %v324_v1 = vadd.f32 %v323_v57, %v322_v49  ;;  %v337_v2 = vrot.slane %v336_v58, 2  ;;  %v382_v3 = vrot.slane %v381_v59, 4  ;;  %v389_v4 = vrot.slane %v388_v60, 4 }
  0x74   : > { %v318_v5 = vrot.slane %v317_v61, 1  ;;  %v331_v6 = vadd.f32 %v330_v62, %v329_v54  ;;  %v370_v7 = vrot.slane %v369_v63, 2  ;;  %v377_v8 = vrot.slane %v376_v0, 2 }
  0x75   : > { %v325_v9 = vrot.slane %v324_v1, 1  ;;  %v338_v10 = vadd.f32 %v337_v2, %v336_v58  ;;  %v383_v11 = vadd.f32 %v382_v3, %v381_v59  ;;  %v390_v12 = vadd.f32 %v389_v4, %v388_v60 }
  0x76   : > { %v319_v13 = vadd.f32 %v318_v5, %v317_v61  ;;  %v332_v14 = vrot.slane %v331_v6, 1  ;;  %v371_v15 = vadd.f32 %v370_v7, %v369_v63  ;;  %v378_v16 = vadd.f32 %v377_v8, %v376_v0 }
  0x77   : > { %v326_v17 = vadd.f32 %v325_v9, %v324_v1  ;;  %v339_v18 = vrot.slane %v338_v10, 1  ;;  %v384_v19 = vrot.slane %v383_v11, 2  ;;  %v391_v20 = vrot.slane %v390_v12, 2 }
  0x78   : > { %v333_v21 = vadd.f32 %v332_v14, %v331_v6  ;;  %v372_v22 = vrot.slane %v371_v15, 1  ;;  %v379_v23 = vrot.slane %v378_v16, 1 }
  0x79   : > { %v340_v25 = vadd.f32 %v339_v18, %v338_v10  ;;  %v346_v26 = vsel %vm345_vm1, %v326_v17, %v319_v13  ;;  %v385_v27 = vadd.f32 %v384_v19, %v383_v11  ;;  %v392_v28 = vadd.f32 %v391_v20, %v390_v12 }
  0x7a   : > { %v348_v29 = vsel %vm347_vm2, %v333_v21, %v346_v26  ;;  %v373_v30 = vadd.f32 %v372_v22, %v371_v15  ;;  %v380_v31 = vadd.f32 %v379_v23, %v378_v16 }
  0x7b   : > { %v350_v32 = vsel %vm349_vm3, %v340_v25, %v348_v29  ;;  %v386_v33 = vrot.slane %v385_v27, 1  ;;  %v393_v34 = vrot.slane %v392_v28, 1 }
  0x7c   : > { %v352_v35 = vadd.f32 %v350_v32, %v307_v24  ;;  %v399_v36 = vsel %vm345_vm1, %v380_v31, %v373_v30 }
  0x7d   : > { %v387_v37 = vadd.f32 %v386_v33, %v385_v27  ;;  %v394_v38 = vadd.f32 %v393_v34, %v392_v28 }
  0x7e   : > { %353 = vst [vmem:[%s1078_s23] sm:$0xf] %v352_v35 }
  0x7f   : > { %v400_v40 = vsel %vm347_vm2, %v387_v37, %v399_v36 }
  0x80   : > { %762 = shalt.err (!%p759_p11)
}
  0x81   : > { %s763_s28 = scalar_lea.hbm %s1104_s29, 64  ;;  %s767_s23 = scalar_lea.hbm %s1194_s2, 128 }
  0x82   : > { %p764_p1 = scmp.ne.s32.totalorder %s1104_s29, %s763_s28  ;;  %p768_p5 = scmp.lt.u32.totalorder %s1104_s29, %s1194_s2 }
  0x83   : > { %p769_p4 = scmp.lt.u32.totalorder %s767_s23, %s763_s28  ;;  %p771_p0 = scmp.lt.u32.totalorder %s763_s28, %s1104_s29 }
  0x84   : > { %p765_p6 = pnand %p764_p1, %p1206_p3 }
  0x85   : > { %p770_p8 = por %p769_p4, %p768_p5 }
  0x86   : > { %p766_p2 = pneg %p765_p6 }
  0x87   : > { %p772_p12 = por %p771_p0, %p770_p8 }
  0x89   : > { %p773_p13 = pnand %p772_p12, %p766_p2 }
  0x8b   : > { %776 = shalt.err (!%p773_p13)
}
  0x8c   : > { %610 = dma.vmem_to_hbm [thread:$0]  (%p1206_p3), %s1106_s7, 64, %s1104_s29, %s406_s30   ;;  %v401_v41 = vsel %vm349_vm3, %v394_v38, %v400_v40 }
  0x8d   : > { %v403_v42 = vadd.f32 %v401_v41, %v354_v39  ;;  %s1140_s21 = scalar_lea.hbm %s1195_s3, %s600_s24  ;;  %s411_s9 = scalar_lea.sflag [#allocation9], %s1064_s8 }
  0x8e   : > { %s777_s28 = scalar_lea.vmem %s1144_s5, 64  ;;  %s875_s7 = smov [#allocation8]  }
  0x8f   : > { %404 = vst [vmem:[%s1081_s4] sm:$0xf] %v403_v42  ;;  %p778_p7 = scmp.ne.s32.totalorder %s1144_s5, %s777_s28  ;;  %s781_s15 = sshll.u32 %s875_s7, 4  ;;  %s782_s15 = int_to_ptr.vmem [resolvable:$false] %s781_s15 }
  0x90   : > { %s783_s29 = scalar_lea.vmem %s782_s15, 128  ;;  %p784_p11 = scmp.lt.s32.totalorder %s1144_s5, %s782_s15 }
  0x91   : > { %p779_p10 = pnand %p778_p7, %p1206_p3  ;;  %p785_p1 = scmp.lt.s32.totalorder %s783_s29, %s777_s28 }
  0x93   : > { %p780_p9 = pneg %p779_p10  ;;  %p786_p6 = por %p785_p1, %p784_p11 }
  0x95   : > { %p787_p2 = pnand %p786_p6, %p780_p9 }
  0x97   : > { %790 = shalt.err (!%p787_p2)
}
  0x98   : > { %s791_s8 = scalar_lea.hbm %s1140_s21, 64  ;;  %s795_s30 = scalar_lea.hbm %s1195_s3, 128 }
  0x99   : > { %p792_p5 = scmp.ne.s32.totalorder %s1140_s21, %s791_s8  ;;  %p796_p0 = scmp.lt.u32.totalorder %s1140_s21, %s1195_s3 }
  0x9a   : > { %p797_p12 = scmp.lt.u32.totalorder %s795_s30, %s791_s8  ;;  %p799_p7 = scmp.lt.u32.totalorder %s791_s8, %s1140_s21 }
  0x9b   : > { %p793_p4 = pnand %p792_p5, %p1206_p3 }
  0x9c   : > { %p798_p13 = por %p797_p12, %p796_p0 }
  0x9d   : > { %p794_p8 = pneg %p793_p4 }
  0x9e   : > { %p800_p10 = por %p799_p7, %p798_p13 }
  0xa0   : > { %p801_p9 = pnand %p800_p10, %p794_p8 }
  0xa2   : > { %804 = shalt.err (!%p801_p9)
}
  0xa3   : > { %611 = dma.vmem_to_hbm [thread:$0]  (%p1206_p3), %s1144_s5, 64, %s1140_s21, %s411_s9  }
  0xa4 PF: > { %s451_s23 = sand.u32 1, %s847_s12   ;;  %p1207_p11 = scmp.ne.s32.totalorder %s1201_s27, 0 }
  0xa5   : > { %p1208_p1 = scmp.ge.s32.totalorder %s867_s17, 2  ;;  %s452_s6 = scalar_lea.sflag [#allocation4], %s451_s23 }
  0xa7   : > { %p622_p6 = pnand %p1208_p1, %p1207_p11 }
  0xa9   : > { %838 = dma.done.wait (!%p622_p6), %s452_s6, 64  }
  0xaa   : > { %840 = vsyncadd (!%p622_p6), %s452_s6, 4294967232  ;;  %s461_s22 = scalar_lea.sflag [#allocation9], %s451_s23 }
  0xab   : > { %842 = dma.done.wait (!%p622_p6), %s461_s22, 64  }
  0xac   : > { %844 = vsyncadd (!%p622_p6), %s461_s22, 4294967232  ;;  %s26_s17 = sadd.s32 1, %s867_s17   ;;  %s1209_s12 = smov %s851_s13 }
  0xad   : > { %p23_p2 = scmp.ge.s32.totalorder %s26_s17, 4   ;;  %s1210_s13 = smov %s855_s14 }
  0xae   : > { %s1211_s14 = smov %s952_s26  ;;  %s1212_s15 = smov %s863_s16 }
  0xaf   : > { %s1213_s16 = smov %s1215_s20  ;;  %25 = sbr.rel (!%p23_p2) target bundleno = 10 (0xa), region = 107 }
  0xb6   :  { %466 = vsyncpa [#allocation3], 1 }
  0xb7   :  { %468 = vsyncpa [#allocation3 + $0x1], 1 }
  0xb8   :  { %469 = vsyncpa [#allocation6], 1 }
  0xb9   :  { %471 = vsyncpa [#allocation6 + $0x1], 1 }
  0xba   :  { %472 = vsyncpa [#allocation4], 1 }
  0xbb   :  { %474 = vsyncpa [#allocation4 + $0x1], 1 }
  0xbc   :  { %475 = vsyncpa [#allocation9], 1 }
  0xbd   :  { %477 = vsyncpa [#allocation9 + $0x1], 1 }

</bundles_post_ra>
